<compile_context>
chip_gen: v7x
topology: tpu7x:2x2x1
jax: 0.10.0
libtpu: 0.0.40
codegen_flags: <defaults>
</compile_context>

<pallas_src>
import math

import jax
import jax.numpy as jnp
from jax.experimental import pallas as pl
from jax.experimental.pallas import tpu as pltpu


def _gcn_fused_kernel(adj_ref, x_ref, w_ref, b_ref, o_ref, acc_ref):
    """One (row-tile i, K-tile k) step of  adj @ (x @ W) + b."""
    k = pl.program_id(1)

    @pl.when(k == 0)
    def _init():
        acc_ref[...] = jnp.zeros_like(acc_ref)

    # Support slice for this K block: (tk, F_pad), computed on-chip (MXU),
    # never written to HBM.
    support = jnp.dot(x_ref[...], w_ref[...],
                      preferred_element_type=jnp.float32)
    # Aggregate: adj row-tile x support slice, f32 accumulation (MXU).
    acc_ref[...] += jnp.dot(adj_ref[...], support.astype(adj_ref.dtype),
                            preferred_element_type=jnp.float32)

    @pl.when(k == pl.num_programs(1) - 1)
    def _finalize():
        # Bias broadcast + store exactly once per output tile (lane-dense vst).
        o_ref[...] = (acc_ref[...] + b_ref[...]).astype(o_ref.dtype)


def gcn_forward(x, adj, weight, bias=None, *, tm=128, tk=128,
                compute_dtype=jnp.bfloat16):
    """GraphConvolution.forward: adj @ (x @ weight) + bias (fused kernel)."""
    n, f_in = x.shape
    f_out = weight.shape[1]
    assert adj.shape == (n, n)

    # ---- padding for tile / lane alignment ----------------------------------
    f_pad = pl.cdiv(f_out, 128) * 128            # lane-dense output last dim
    blk = math.lcm(tm, tk)
    n_pad = pl.cdiv(n, blk) * blk                # rows divisible by both tiles

    if n_pad != n:
        adj = jnp.pad(adj, ((0, n_pad - n), (0, n_pad - n)))
        x = jnp.pad(x, ((0, n_pad - n), (0, 0)))
    w = weight
    if f_pad != f_out:
        w = jnp.pad(w, ((0, 0), (0, f_pad - f_out)))
    b = bias if bias is not None else jnp.zeros((f_out,), jnp.float32)
    b = jnp.pad(b.astype(jnp.float32), (0, f_pad - f_out)).reshape(1, f_pad)

    # ---- dtype: bf16 for the HBM-dominant streams, f32 accumulation ----------
    adj_c = adj.astype(compute_dtype)
    x_c = x.astype(compute_dtype)
    w_c = w.astype(compute_dtype)

    grid = (n_pad // tm, n_pad // tk)

    cost = pl.CostEstimate(
        flops=2 * n_pad * n_pad * f_pad
        + 2 * grid[0] * n_pad * f_in * f_pad,          # support recompute/row-tile
        transcendentals=0,
        bytes_accessed=n_pad * n_pad * adj_c.dtype.itemsize
        + grid[0] * n_pad * f_in * x_c.dtype.itemsize
        + f_in * f_pad * w_c.dtype.itemsize
        + n_pad * f_pad * 4,
    )

    out = pl.pallas_call(
        _gcn_fused_kernel,
        out_shape=jax.ShapeDtypeStruct((n_pad, f_pad), jnp.float32),
        grid_spec=pltpu.PrefetchScalarGridSpec(
            num_scalar_prefetch=0,
            grid=grid,
            in_specs=[
                pl.BlockSpec((tm, tk), lambda i, k: (i, k)),       # adj tile
                pl.BlockSpec((tk, f_in), lambda i, k: (k, 0)),     # x K-slice
                pl.BlockSpec((f_in, f_pad), lambda i, k: (0, 0)),  # weight
                pl.BlockSpec((1, f_pad), lambda i, k: (0, 0)),     # bias (f32)
            ],
            out_specs=pl.BlockSpec((tm, f_pad), lambda i, k: (i, 0)),
            scratch_shapes=[pltpu.VMEM((tm, f_pad), jnp.float32)],
        ),
        compiler_params=pltpu.CompilerParams(
            dimension_semantics=("parallel", "arbitrary"),
            vmem_limit_bytes=32 * 1024 * 1024,
        ),
        cost_estimate=cost,
    )(adj_c, x_c, w_c, b)

    return out[:n, :f_out]


def init_gcn_params(key, in_features, out_features):
    """Deterministic re-implementation of GraphConvolution.reset_parameters."""
    stdv = 1.0 / math.sqrt(out_features)
    kw, kb = jax.random.split(key)
    weight = jax.random.uniform(
        kw, (in_features, out_features), jnp.float32, minval=-stdv, maxval=stdv
    )
    bias = jax.random.uniform(
        kb, (out_features,), jnp.float32, minval=-stdv, maxval=stdv
    )
    return weight, bias


if __name__ == "__main__":
    key = jax.random.PRNGKey(0)
    k_x, k_adj, k_p = jax.random.split(key, 3)

    # n // tm == 2 so the row axis splits across both v7x TensorCores, and
    # n // tk == 2 exercises the K-reduction accumulator path.
    n_nodes, in_features, out_features = 256, 64, 32

    # Node features.
    x = jax.random.normal(k_x, (n_nodes, in_features), jnp.float32)

    # Deterministic sparse-ish symmetric adjacency with self-loops,
    # row-normalized (typical GCN preprocessing). torch.spmm on this is
    # semantically a dense matmul.
    a = (jax.random.uniform(k_adj, (n_nodes, n_nodes)) < 0.05).astype(jnp.float32)
    a = jnp.maximum(a, a.T) + jnp.eye(n_nodes, dtype=jnp.float32)
    adj = a / jnp.sum(a, axis=1, keepdims=True)

    weight, bias = init_gcn_params(k_p, in_features, out_features)

    out = gcn_forward(x, adj, weight, bias, tm=128, tk=128)
    out = jax.block_until_ready(out)
    assert out.shape == (n_nodes, out_features)

    # Reference 1: exact mirror of the kernel's bf16 casts (tight check).
    sup_ref = jnp.dot(
        x.astype(jnp.bfloat16), weight.astype(jnp.bfloat16),
        preferred_element_type=jnp.float32,
    ).astype(jnp.bfloat16)
    ref_bf16 = jnp.dot(
        adj.astype(jnp.bfloat16), sup_ref, preferred_element_type=jnp.float32
    ) + bias
    assert jnp.allclose(out, ref_bf16, atol=1e-2, rtol=1e-2)

    # Reference 2: pure f32 math (loose check covering bf16 input quantization).
    ref_f32 = adj @ (x @ weight) + bias
    assert jnp.allclose(out, ref_f32, atol=5e-2, rtol=5e-2)

    print("KERNEL_OK")
</pallas_src>

<mosaic_0001>
module attributes {stable_mosaic.version = 11 : i64} {
  func.func @_gcn_fused_kernel(%arg0: i32, %arg1: i32, %arg2: memref<128x128xbf16, #tpu.memory_space<vmem>>, %arg3: memref<128x64xbf16, #tpu.memory_space<vmem>>, %arg4: memref<64x128xbf16, #tpu.memory_space<vmem>>, %arg5: memref<1x128xf32, #tpu.memory_space<vmem>>, %arg6: memref<128x128xf32, #tpu.memory_space<vmem>>, %arg7: memref<128x128xf32, #tpu.memory_space<vmem>>) attributes {dimension_semantics = [#tpu.dimension_semantics<parallel>, #tpu.dimension_semantics<arbitrary>], iteration_bounds = array<i64: 2, 2>, scalar_prefetch = 0 : i64, scratch_operands = 1 : i64, tpu.core_type = #tpu.core_type<tc>, window_params = [{transform_indices = @transform_0, window_bounds = array<i64: 128, 128>}, {transform_indices = @transform_1, window_bounds = array<i64: 128, 64>}, {pipeline_mode = #tpu.pipeline_mode<synchronous>, transform_indices = @transform_2, window_bounds = array<i64: 64, 128>}, {pipeline_mode = #tpu.pipeline_mode<synchronous>, transform_indices = @transform_3, window_bounds = array<i64: 1, 128>}, {transform_indices = @transform_4, window_bounds = array<i64: 128, 128>}]} {
    %c0_i32 = arith.constant 0 : i32
    %0 = arith.cmpi eq, %arg1, %c0_i32 : i32
    %1 = arith.extui %0 : i1 to i32
    %c0_i32_0 = arith.constant 0 : i32
    %2 = arith.cmpi ne, %1, %c0_i32_0 : i32
    scf.if %2 {
      %cst_12 = arith.constant 0.000000e+00 : f32
      %15 = vector.broadcast %cst_12 : f32 to vector<128x128xf32>
      %c0_13 = arith.constant 0 : index
      %c0_14 = arith.constant 0 : index
      %16 = vector.load %arg7[%c0_13, %c0_14] : memref<128x128xf32, #tpu.memory_space<vmem>>, vector<128x128xf32>
      tpu.vector_store %arg7[%c0_13, %c0_14], %15 {strides = array<i32>} : memref<128x128xf32, #tpu.memory_space<vmem>>, vector<128x128xf32>,
    } else {
    }
    %c0 = arith.constant 0 : index
    %c0_1 = arith.constant 0 : index
    %3 = vector.load %arg3[%c0, %c0_1] : memref<128x64xbf16, #tpu.memory_space<vmem>>, vector<128x64xbf16>
    %c0_2 = arith.constant 0 : index
    %c0_3 = arith.constant 0 : index
    %4 = vector.load %arg4[%c0_2, %c0_3] : memref<64x128xbf16, #tpu.memory_space<vmem>>, vector<64x128xbf16>
    %cst = arith.constant dense<0.000000e+00> : vector<128x128xf32>
    %5 = tpu.matmul %3, %4, %cst {dimension_numbers = #tpu.dot_dimension_numbers<[1], [0], [0], [1], [0, 0, 1, 1], [], []>} : vector<128x64xbf16>, vector<64x128xbf16>, vector<128x128xf32> -> vector<128x128xf32>
    %c0_4 = arith.constant 0 : index
    %c0_5 = arith.constant 0 : index
    %6 = vector.load %arg7[%c0_4, %c0_5] : memref<128x128xf32, #tpu.memory_space<vmem>>, vector<128x128xf32>
    %c0_6 = arith.constant 0 : index
    %c0_7 = arith.constant 0 : index
    %7 = vector.load %arg2[%c0_6, %c0_7] : memref<128x128xbf16, #tpu.memory_space<vmem>>, vector<128x128xbf16>
    %8 = arith.truncf %5 : vector<128x128xf32> to vector<128x128xbf16>
    %cst_8 = arith.constant dense<0.000000e+00> : vector<128x128xf32>
    %9 = tpu.matmul %7, %8, %cst_8 {dimension_numbers = #tpu.dot_dimension_numbers<[1], [0], [0], [1], [0, 0, 1, 1], [], []>} : vector<128x128xbf16>, vector<128x128xbf16>, vector<128x128xf32> -> vector<128x128xf32>
    %10 = arith.addf %6, %9 : vector<128x128xf32>
    %c0_9 = arith.constant 0 : index
    %c0_10 = arith.constant 0 : index
    %11 = vector.load %arg7[%c0_9, %c0_10] : memref<128x128xf32, #tpu.memory_space<vmem>>, vector<128x128xf32>
    tpu.vector_store %arg7[%c0_9, %c0_10], %10 {strides = array<i32>} : memref<128x128xf32, #tpu.memory_space<vmem>>, vector<128x128xf32>,
    %c1_i32 = arith.constant 1 : i32
    %12 = arith.cmpi eq, %arg1, %c1_i32 : i32
    %13 = arith.extui %12 : i1 to i32
    %c0_i32_11 = arith.constant 0 : i32
    %14 = arith.cmpi ne, %13, %c0_i32_11 : i32
    scf.if %14 {
      %c0_12 = arith.constant 0 : index
      %c0_13 = arith.constant 0 : index
      %15 = vector.load %arg7[%c0_12, %c0_13] : memref<128x128xf32, #tpu.memory_space<vmem>>, vector<128x128xf32>
      %c0_14 = arith.constant 0 : index
      %c0_15 = arith.constant 0 : index
      %16 = vector.load %arg5[%c0_14, %c0_15] : memref<1x128xf32, #tpu.memory_space<vmem>>, vector<1x128xf32>
      %17 = vector.broadcast %16 : vector<1x128xf32> to vector<128x128xf32>
      %18 = arith.addf %15, %17 : vector<128x128xf32>
      %c0_16 = arith.constant 0 : index
      %c0_17 = arith.constant 0 : index
      %19 = vector.load %arg6[%c0_16, %c0_17] : memref<128x128xf32, #tpu.memory_space<vmem>>, vector<128x128xf32>
      tpu.vector_store %arg6[%c0_16, %c0_17], %18 {strides = array<i32>} : memref<128x128xf32, #tpu.memory_space<vmem>>, vector<128x128xf32>,
    } else {
    }
    return
  }
  func.func @transform_0(%arg0: i32, %arg1: i32) -> (i32, i32) {
    %c0_i32 = arith.constant 0 : i32
    return %arg0, %arg1 : i32, i32
  }
  func.func @transform_1(%arg0: i32, %arg1: i32) -> (i32, i32) {
    %c0_i32 = arith.constant 0 : i32
    %c0_i32_0 = arith.constant 0 : i32
    return %arg1, %c0_i32 : i32, i32
  }
  func.func @transform_2(%arg0: i32, %arg1: i32) -> (i32, i32) {
    %c0_i32 = arith.constant 0 : i32
    %c0_i32_0 = arith.constant 0 : i32
    %c0_i32_1 = arith.constant 0 : i32
    return %c0_i32, %c0_i32_0 : i32, i32
  }
  func.func @transform_3(%arg0: i32, %arg1: i32) -> (i32, i32) {
    %c0_i32 = arith.constant 0 : i32
    %c0_i32_0 = arith.constant 0 : i32
    %c0_i32_1 = arith.constant 0 : i32
    return %c0_i32, %c0_i32_0 : i32, i32
  }
  func.func @transform_4(%arg0: i32, %arg1: i32) -> (i32, i32) {
    %c0_i32 = arith.constant 0 : i32
    %c0_i32_0 = arith.constant 0 : i32
    return %arg0, %c0_i32 : i32, i32
  }
}

</mosaic_0001>

<bundles_post_ra>
// kernel: tpu_custom_call.1
= control target key start
LH: loop header
LB: loop body
LE: loop exit
PB: predicated region body
PF: predicated region fallthrough
CT: control target
= control target key end

     0   :  { %9 = vsyncpa [#allocation4], 0  ;;  %s1633_s0 = inlined_call_operand.hbm [shape: bf16[256,256], index: 0, kind: input, shape index: {}]   ;;  %s1634_s1 = inlined_call_operand.vmem [shape: bf16[256,64], index: 1, kind: input, shape index: {}]   ;;  %s1635_s2 = inlined_call_operand.vmem [shape: bf16[64,128], index: 2, kind: input, shape index: {}]   ;;  %s1636_s3 = inlined_call_operand.vmem [shape: f32[1,128], index: 3, kind: input, shape index: {}]   ;;  %s1637_s4 = inlined_call_operand.hbm [shape: f32[256,128], index: 4, kind: output, shape index: {}]  }
   0x1   :  { %11 = vsyncpa [#allocation4 + $0x1], 0 }
   0x2   :  { %12 = vsyncpa [#allocation5], 0 }
   0x3   :  { %14 = vsyncpa [#allocation5 + $0x1], 0  ;;  %s1341_s15 = smov 0   ;;  %s1343_s16 = smov 0  }
   0x4   :  { %s1345_s17 = smov 0   ;;  %s1347_s18 = smov 0  }
   0x5   :  { %s1349_s19 = smov 0   ;;  %s1351_s20 = smov 0  }
   0x6   :  { %s1353_s21 = smov 0   ;;  %s1355_s22 = smov 0  }
   0x7   :  { %s1357_s23 = smov 0   ;;  %s1359_s24 = smov 0  }
   0x8   :  { %s1361_s25 = smov 0  }
   0x9 LB: > { %s875_s26 = sadd.s32 4294967295, %s1306_s25   ;;  %s876_s27 = sadd.s32 4294967294, %s1306_s25   ;;  %s1306_s25 = sphi %s1361_s25, %s20_s25   ;;  %s1302_s24 = sphi %s1359_s24, %s1663_s24   ;;  %s1298_s23 = sphi %s1357_s23, %s1662_s23   ;;  %s1294_s22 = sphi %s1355_s22, %s1661_s22   ;;  %s1290_s21 = sphi %s1353_s21, %s1660_s21   ;;  %s1286_s20 = sphi %s1351_s20, %s1659_s20   ;;  %s1282_s19 = sphi %s1349_s19, %s1658_s19   ;;  %s1278_s18 = sphi %s1347_s18, %s1657_s18   ;;  %s1274_s17 = sphi %s1345_s17, %s1656_s17   ;;  %s1270_s16 = sphi %s1343_s16, %s1655_s16   ;;  %s1266_s15 = sphi %s1341_s15, %s1654_s15  }
   0xa   : > { %s29_s28 = sadd.s32 1, %s1298_s23  ;;  %s32_s29 = sadd.s32 1, %s1302_s24 }
   0xb   : > { %p30_p0 = scmp.ge.s32.totalorder %s29_s28, 2  ;;  %s41_s30 = sadd.s32 1, %s1286_s20 }
   0xc   : > { %p48_p1 = scmp.ne.s32.totalorder %s1286_s20, %s1282_s19  ;;  %p49_p2 = scmp.eq.s32.totalorder %s1306_s25, 0 }
   0xd   : > { %s1665_s28 = smov (%p30_p0, %s29_s28), 0  ;;  %s1667_s29 = smov (!%p30_p0, %s32_s29), %s1302_s24 }
   0xe   : > { %1641 = sst [smem:[#allocation9_spill]] %s1665_s28  ;;  %s37_s5 = ssub.s32 %s1298_s23, %s1665_s28 }
   0xf   : > { %p1407_p3 = por %p49_p2, %p48_p1  ;;  %p34_p4 = scmp.ge.s32.totalorder %s1667_s29, 2 }
  0x10   : > { %p54_p5 = scmp.ne.s32.totalorder %s1282_s19, %s1278_s18  ;;  %p55_p6 = scmp.eq.s32.totalorder %s875_s26, 0 }
  0x11   : > { %s135_s7 = sadd.s32 1, %s1274_s17  ;;  %s1669_s29 = smov (%p34_p4, %s1667_s29), 0 }
  0x12   : > { %1643 = sst [smem:[#allocation10_spill]] %s1669_s29  ;;  %p1415_p7 = por %p55_p6, %p54_p5 }
  0x13   : > { %p145_p8 = scmp.ne.s32.totalorder %s1274_s17, %s1270_s16  ;;  %s36_s9 = ssub.s32 %s1302_s24, %s1669_s29 }
  0x14   : > { %p146_p9 = scmp.eq.s32.totalorder %s875_s26, 3  ;;  %s38_s10 = sor.u32 %s37_s5, %s36_s9 }
  0x15   : > { %p133_p10 = scmp.eq.s32.totalorder %s36_s9, 0  ;;  %p39_p11 = scmp.eq.s32.totalorder %s38_s10, 0 }
  0x16   : > { %p1423_p12 = por %p146_p9, %p145_p8  ;;  %p151_p13 = scmp.ne.s32.totalorder %s1270_s16, %s1266_s15 }
  0x17   : > { %s1428_s12 = scalar_select %p133_p10, %s1274_s17, %s135_s7  }
  0x18   : > { %s1645_s11 = scalar_select %p1423_p12, 1, 0 }
  0x19   : > { %1646 = sst [smem:[#allocation11_spill]] %s1428_s12  ;;  %p152_p0 = scmp.eq.s32.totalorder %s876_s27, 3 }
  0x1a   : > { %s1431_s13 = scalar_select %p39_p11, %s1286_s20, %s41_s30  }
  0x1b   : > { %p1038_p1 = scmp.lt.s32.totalorder %s1306_s25, 4  ;;  %p1436_p2 = por %p152_p0, %p151_p13 }
  0x1c   : > { %s178_s18 = sand.u32 1, %s1286_s20   ;;  %s924_s5 = sshll.u32 %s1302_s24, 5 }
  0x1d   : > { %s1647_s14 = scalar_select %p1436_p2, 1, 0 }
  0x1e   : > { %s879_s26 = sshll.u32 %s178_s18, 6  ;;  %s188_s9 = sadd.s32 %s1298_s23, %s924_s5 }
  0x1f   : > { %s182_s10 = scalar_lea.vmem [#allocation3], %s879_s26  ;;  %s882_s28 = sshll.u32 %s188_s9, 6 }
  0x20   : > { %s191_s29 = sshll.u32 %s182_s10, 4  ;;  %s1448_s30 = scalar_lea.hbm %s1633_s0, %s882_s28  ;;  %s1443_s29 = int_to_ptr.vmem [resolvable:$true] %s191_s29 }
  0x21   : > { %p1452_p4 = pnand %p1038_p1, %p1407_p3  ;;  %s1456_s26 = scalar_lea.sflag [#allocation4], %s178_s18 }
  0x22   : > { %s1154_s5 = scalar_lea.hbm %s1448_s30, 1024  ;;  %s1159_s12 = scalar_lea.hbm %s1633_s0, 4096 }
  0x23   : > { %p1155_p5 = scmp.ne.s32.totalorder %s1448_s30, %s1154_s5  ;;  %p1156_p6 = pneg %p1452_p4 }
  0x24   : > { %p1160_p3 = scmp.lt.u32.totalorder %s1448_s30, %s1633_s0  ;;  %p1161_p10 = scmp.lt.u32.totalorder %s1159_s12, %s1154_s5 }
  0x25   : > { %p1157_p8 = pnand %p1156_p6, %p1155_p5  ;;  %p1163_p13 = scmp.lt.u32.totalorder %s1154_s5, %s1448_s30 }
  0x26   : > { %p1162_p11 = por %p1161_p10, %p1160_p3 }
  0x27   : > { %p1158_p9 = pneg %p1157_p8 }
  0x28   : > { %p1164_p0 = por %p1163_p13, %p1162_p11 }
  0x2a   : > { %p1165_p1 = pnand %p1164_p0, %p1158_p9 }
  0x2c   : > { %1168 = shalt.err (!%p1165_p1)
}
  0x2d   : > { %s1169_s18 = scalar_lea.vmem %s1443_s29, 1024  ;;  %s1308_s7 = smov [#allocation3]  }
  0x2e   : > { %p1170_p5 = scmp.ne.s32.totalorder %s1443_s29, %s1169_s18  ;;  %s1174_s28 = sshll.u32 %s1308_s7, 4  ;;  %s1175_s28 = int_to_ptr.vmem [resolvable:$false] %s1174_s28 }
  0x2f   : > { %s1176_s6 = scalar_lea.vmem %s1175_s28, 2048  ;;  %p1177_p12 = scmp.lt.s32.totalorder %s1443_s29, %s1175_s28 }
  0x30   : > { %p1172_p8 = pnand %p1170_p5, %p1156_p6  ;;  %p1178_p3 = scmp.lt.s32.totalorder %s1176_s6, %s1169_s18 }
  0x32   : > { %p1173_p2 = pneg %p1172_p8  ;;  %p1179_p10 = por %p1178_p3, %p1177_p12 }
  0x34   : > { %p1180_p11 = pnand %p1179_p10, %p1173_p2 }
  0x36   : > { %1183 = shalt.err (!%p1180_p11)
}
  0x37   : > { %s1309_s5 = smov 128   ;;  %s1310_s12 = smov 64  }
  0x38   : > { %s1311_s9 = smov 4   ;;  %p883_p6 = scmp.ge.s32.totalorder %s1306_s25, 1 }
  0x39   : > { %1033 = dma.hbm_to_vmem [thread:$0]  (!%p1452_p4), %s1448_s30, 1024, %s1443_s29, %s1456_s26, %s1309_s5, %s1310_s12, %s1311_s9  }
  0x3a   : > { %p208_p9 = scmp.lt.s32.totalorder %s1306_s25, 5 }
  0x3c   : > { %p209_p13 = pnand %p883_p6, %p208_p9 }
  0x3d   : > { %s214_s10 = sand.u32 (!%p209_p13), 1, %s1282_s19  }
  0x3e   : > { %212 = sbr.rel (%p209_p13) target bundleno = 618 (0x26a), region = 36  ;;  %s884_s18 = sshll.u32 (!%p209_p13), %s214_s10, 6 }
  0x3f   : > { %s215_s7 = scalar_lea.sflag (!%p209_p13), [#allocation4], %s214_s10  ;;  %s1487_s28 = scalar_lea.vmem (!%p209_p13), [#allocation3], %s884_s18 }
  0x45   : > { %1257 = dma.done.wait (%p1415_p7), %s215_s7, 1024  }
  0x46   : > { %1259 = vsyncadd (%p1415_p7), %s215_s7, 4294966272  ;;  %s245_s29 = sand.u32 1, %s1270_s16   ;;  %s886_s30 = sshll.u32 %s1290_s21, 4 }
  0x47   : > { %s885_s27 = sshll.u32 %s245_s29, 7  ;;  %p250_p12 = scmp.lt.s32.totalorder %s886_s30, 31 }
  0x48   : > { %s1502_s9 = scalar_lea.vmem [#allocation6], %s885_s27  ;;  %p888_p2 = scmp.ne.s32.totalorder %s1290_s21, 0 }
  0x49   : > { %s1671_s30 = smov (!%p250_p12, %s886_s30), 31  ;;  %v1312_v0 = vmov (!%p888_p2), 0.0  }
  0x4a   : > { %s887_s26 = sshll.u32 %s1671_s30, 2  ;;  %260 = sbr.rel (%p888_p2) target bundleno = 82 (0x52), region = 44  ;;  %261 = vst [vmem:[#allocation2] sm:$0xff] (!%p888_p2), %v1312_v0  ;;  %262 = vst [vmem:[#allocation2 + $0x8] sm:$0xff] (!%p888_p2), %v1312_v0 }
  0x4b   : > { %s1500_s12 = scalar_lea.vmem %s1634_s1, %s887_s26  ;;  %263 = vst [vmem:[#allocation2 + $0x10] sm:$0xff] (!%p888_p2), %v1312_v0  ;;  %264 = vst [vmem:[#allocation2 + $0x18] sm:$0xff] (!%p888_p2), %v1312_v0 }
  0x4c   : > { %265 = vst [vmem:[#allocation2 + $0x20] sm:$0xff] (!%p888_p2), %v1312_v0  ;;  %266 = vst [vmem:[#allocation2 + $0x28] sm:$0xff] (!%p888_p2), %v1312_v0 }
  0x4d   : > { %267 = vst [vmem:[#allocation2 + $0x30] sm:$0xff] (!%p888_p2), %v1312_v0  ;;  %268 = vst [vmem:[#allocation2 + $0x38] sm:$0xff] (!%p888_p2), %v1312_v0 }
  0x4e   : > { %269 = vst [vmem:[#allocation2 + $0x40] sm:$0xff] (!%p888_p2), %v1312_v0  ;;  %270 = vst [vmem:[#allocation2 + $0x48] sm:$0xff] (!%p888_p2), %v1312_v0 }
  0x4f   : > { %271 = vst [vmem:[#allocation2 + $0x50] sm:$0xff] (!%p888_p2), %v1312_v0  ;;  %272 = vst [vmem:[#allocation2 + $0x58] sm:$0xff] (!%p888_p2), %v1312_v0 }
  0x50   : > { %273 = vst [vmem:[#allocation2 + $0x60] sm:$0xff] (!%p888_p2), %v1312_v0  ;;  %274 = vst [vmem:[#allocation2 + $0x68] sm:$0xff] (!%p888_p2), %v1312_v0 }
  0x51   : > { %275 = vst [vmem:[#allocation2 + $0x70] sm:$0xff] %v1312_v0  ;;  %276 = vst [vmem:[#allocation2 + $0x78] sm:$0xff] %v1312_v0 }
  0x52 PF: > { %v1134_v1 = vld [vmem:[%s1635_s2] sm:$0xff]   ;;  %v1135_v2 = vld [vmem:[%s1635_s2 + $0x8] sm:$0xff]   ;;  %v1136_v3 = vld [vmem:[%s1635_s2 + $0x10] sm:$0xff]   ;;  %vm365_vm0 = vcmask 523264   ;;  %p917_p7 = scmp.ne.s32.totalorder %s1290_s21, 1 }
  0x53   : > { %954 = vmatprep.subr.bf16.mxu0 %v1134_v1  ;;  %v1138_v4 = vld [vmem:[%s1500_s12] sm:$0xff]   ;;  %v1137_v5 = vld [vmem:[%s1635_s2 + $0x18] sm:$0xff]   ;;  %v1139_v6 = vld [vmem:[%s1500_s12 + $0x8] sm:$0xff]  }
  0x54   : > { %955 = vmatpush3.bf16.msra.mxu0 %v1134_v1  ;;  %962 = vmatprep.mubr.msk.bf16.mxu0 %vm365_vm0, %v1138_v4  ;;  %v1140_v7 = vld [vmem:[%s1500_s12 + $0x10] sm:$0xff]   ;;  %v1141_v8 = vld [vmem:[%s1500_s12 + $0x18] sm:$0xff]   ;;  %v1142_v9 = vld [vmem:[%s1500_s12 + $0x20] sm:$0xff]  }
  0x55   : > { %956 = vmatprep.subr.bf16.mxu0 %v1135_v2  ;;  %v1143_v10 = vld [vmem:[%s1500_s12 + $0x28] sm:$0xff]   ;;  %v1144_v11 = vld [vmem:[%s1500_s12 + $0x30] sm:$0xff]   ;;  %v1145_v12 = vld [vmem:[%s1500_s12 + $0x38] sm:$0xff]  }
  0x56   : > { %v1146_v13 = vld [vmem:[%s1487_s28 + $0x10] sm:$0xff]   ;;  %v1150_v14 = vld [vmem:[%s1487_s28] sm:$0xff]   ;;  %v1147_v39 = vld [vmem:[%s1487_s28 + $0x18] sm:$0xff]  }
  0x57   : > { %998 = vmatprep.mubr.bf16.mxu1 %v1146_v13  ;;  %v1151_v40 = vld [vmem:[%s1487_s28 + $0x8] sm:$0xff]   ;;  %v1148_v41 = vld [vmem:[%s1487_s28 + $0x20] sm:$0xff]   ;;  %v1152_v43 = vld [vmem:[%s1487_s28 + $0x30] sm:$0xff]  }
  0x58   : > { %957 = vmatpush3.bf16.msra.mxu0 %v1135_v2  ;;  %v1149_v42 = vld [vmem:[%s1487_s28 + $0x28] sm:$0xff]   ;;  %v1153_v44 = vld [vmem:[%s1487_s28 + $0x38] sm:$0xff]   ;;  %v493_v45 = vld [vmem:[#allocation2 + $0x30] sm:$0xff] }
  0x59   : > { %958 = vmatprep.subr.bf16.mxu0 %v1136_v3  ;;  %v489_v46 = vld [vmem:[#allocation2 + $0x10] sm:$0xff]  ;;  %v491_v47 = vld [vmem:[#allocation2 + $0x20] sm:$0xff]  ;;  %v494_v50 = vld [vmem:[#allocation2 + $0x38] sm:$0xff] }
  0x5a   : > { %v487_v48 = vld [vmem:[#allocation2] sm:$0xff]  ;;  %v490_v52 = vld [vmem:[#allocation2 + $0x18] sm:$0xff]  ;;  %v492_v55 = vld [vmem:[#allocation2 + $0x28] sm:$0xff] }
  0x5b   : > { %v488_v58 = vld [vmem:[#allocation2 + $0x8] sm:$0xff] }
  0x5c   : > { %959 = vmatpush3.bf16.msra.mxu0 %v1136_v3 }
  0x5d   : > { %960 = vmatprep.subr.bf16.mxu0 %v1137_v5 }
  0x60   : > { %961 = vmatpush3.bf16.msra.mxu0 %v1137_v5  ;;  %v497_v5 = vld [vmem:[#allocation2 + $0x50] sm:$0xff] }
  0x63   : > { %963 = vmatmul.mubr.msk.bf16.vlgmr.msra.gmra.mrb[0].mxu0 %vm365_vm0, %v1139_v6  ;;  %v495_v6 = vld [vmem:[#allocation2 + $0x40] sm:$0xff] }
  0x64   : > { %966 = vmatprep.mubr.msk.bf16.mxu0 %vm365_vm0, %v1140_v7 }
  0x6b   : > { %967 = vmatmul.mubr.msk.bf16.gmra.mrb[4].mxu0 %vm365_vm0, %v1141_v8  ;;  %v498_v8 = vld [vmem:[#allocation2 + $0x58] sm:$0xff] }
  0x6c   : > { %970 = vmatprep.mubr.msk.bf16.mxu0 %vm365_vm0, %v1142_v9 }
  0x73   : > { %971 = vmatmul.mubr.msk.bf16.gmra.mrb[8].mxu0 %vm365_vm0, %v1143_v10 }
  0x74   : > { %974 = vmatprep.mubr.msk.bf16.mxu0 %vm365_vm0, %v1144_v11  ;;  %v496_v11 = vld [vmem:[#allocation2 + $0x48] sm:$0xff] }
  0x7b   : > { %975 = vmatmul.mubr.msk.bf16.gmra.mrb[12].mxu0 %vm365_vm0, %v1145_v12 }
  0x7c   : > { %994 = vmatprep.mubr.bf16.mxu0 %v1150_v14 }
 0x136   : > { %v964_v15 = vpop.f32.mrb[0].mxu0 }
 0x137   : > { %v424_v16 = vpop.f32.mrb[1].mxu0 }
 0x138   : > { %v965_v17 = vpop.f32.mrb[2].mxu0 }
 0x139   : > { %v520_v18 = vpack.c.bf16 %v965_v17, %v964_v15  ;;  %v427_v19 = vpop.f32.mrb[3].mxu0  ;;  %v501_v17 = vld [vmem:[#allocation2 + $0x70] sm:$0xff] }
 0x13a   : > { %v519_v20 = vpack.c.bf16 %v427_v19, %v424_v16 }
 0x13c   : > { %978 = vmatprep.subr.bf16.mxu0 %v519_v20  ;;  %1010 = vmatprep.subr.bf16.mxu1 %v519_v20 }
 0x13d   : > { %979 = vmatpush3.bf16.msra.mxu0 %v519_v20  ;;  %1018 = vmatpush3.bf16.msra.mxu1 %v519_v20  ;;  %v502_v20 = vld [vmem:[#allocation2 + $0x78] sm:$0xff] }
 0x13e   : > { %v968_v21 = vpop.f32.mrb[4].mxu0  ;;  %980 = vmatprep.subr.bf16.mxu0 %v520_v18  ;;  %1011 = vmatprep.subr.bf16.mxu1 %v520_v18 }
 0x13f   : > { %v440_v22 = vpop.f32.mrb[5].mxu0 }
 0x140   : > { %v969_v23 = vpop.f32.mrb[6].mxu0 }
 0x141   : > { %v522_v24 = vpack.c.bf16 %v969_v23, %v968_v21  ;;  %v443_v25 = vpop.f32.mrb[7].mxu0  ;;  %981 = vmatpush3.bf16.msra.mxu0 %v520_v18  ;;  %1019 = vmatpush3.bf16.msra.mxu1 %v520_v18  ;;  %v499_v18 = vld [vmem:[#allocation2 + $0x60] sm:$0xff]  ;;  %v500_v23 = vld [vmem:[#allocation2 + $0x68] sm:$0xff] }
 0x142   : > { %v521_v26 = vpack.c.bf16 %v443_v25, %v440_v22 }
 0x144   : > { %982 = vmatprep.subr.bf16.mxu0 %v521_v26  ;;  %1012 = vmatprep.subr.bf16.mxu1 %v521_v26 }
 0x145   : > { %983 = vmatpush3.bf16.msra.mxu0 %v521_v26  ;;  %1020 = vmatpush3.bf16.msra.mxu1 %v521_v26 }
 0x146   : > { %v972_v27 = vpop.f32.mrb[8].mxu0  ;;  %984 = vmatprep.subr.bf16.mxu0 %v522_v24  ;;  %1013 = vmatprep.subr.bf16.mxu1 %v522_v24 }
 0x147   : > { %v456_v28 = vpop.f32.mrb[9].mxu0 }
 0x148   : > { %v973_v29 = vpop.f32.mrb[10].mxu0 }
 0x149   : > { %v524_v30 = vpack.c.bf16 %v973_v29, %v972_v27  ;;  %v459_v31 = vpop.f32.mrb[11].mxu0  ;;  %985 = vmatpush3.bf16.msra.mxu0 %v522_v24  ;;  %1021 = vmatpush3.bf16.msra.mxu1 %v522_v24 }
 0x14a   : > { %v523_v32 = vpack.c.bf16 %v459_v31, %v456_v28 }
 0x14c   : > { %986 = vmatprep.subr.bf16.mxu0 %v523_v32  ;;  %1014 = vmatprep.subr.bf16.mxu1 %v523_v32 }
 0x14d   : > { %987 = vmatpush3.bf16.msra.mxu0 %v523_v32  ;;  %1022 = vmatpush3.bf16.msra.mxu1 %v523_v32 }
 0x14e   : > { %v976_v33 = vpop.f32.mrb[12].mxu0  ;;  %988 = vmatprep.subr.bf16.mxu0 %v524_v30  ;;  %1015 = vmatprep.subr.bf16.mxu1 %v524_v30 }
 0x14f   : > { %v472_v34 = vpop.f32.mrb[13].mxu0 }
 0x150   : > { %v977_v35 = vpop.f32.mrb[14].mxu0 }
 0x151   : > { %v526_v36 = vpack.c.bf16 %v977_v35, %v976_v33  ;;  %v475_v37 = vpop.f32.mrb[15].mxu0  ;;  %989 = vmatpush3.bf16.msra.mxu0 %v524_v30  ;;  %1023 = vmatpush3.bf16.msra.mxu1 %v524_v30  ;;  %v918_v30 = vld [vmem:[%s1636_s3] ss:$0 sm:$0xff] (!%p917_p7) }
 0x152   : > { %v525_v38 = vpack.c.bf16 %v475_v37, %v472_v34 }
 0x154   : > { %990 = vmatprep.subr.bf16.mxu0 %v525_v38  ;;  %1016 = vmatprep.subr.bf16.mxu1 %v525_v38 }
 0x155   : > { %991 = vmatpush3.bf16.msra.mxu0 %v525_v38  ;;  %1024 = vmatpush3.bf16.msra.mxu1 %v525_v38 }
 0x156   : > { %992 = vmatprep.subr.bf16.mxu0 %v526_v36  ;;  %1017 = vmatprep.subr.bf16.mxu1 %v526_v36 }
 0x159   : > { %993 = vmatpush3.bf16.msra.mxu0 %v526_v36  ;;  %1025 = vmatpush3.bf16.msra.mxu1 %v526_v36 }
 0x15c   : > { %999 = vmatmul.mubr.bf16.vlgmr.msra.gmra.mrb[0].mxu1 %v1147_v39  ;;  %995 = vmatmul.mubr.bf16.vlgmr.msra.gmra.mrb[16].mxu0 %v1151_v40 }
 0x15d   : > { %1002 = vmatprep.mubr.bf16.mxu1 %v1148_v41 }
 0x164   : > { %1003 = vmatmul.mubr.bf16.gmra.mrb[4].mxu1 %v1149_v42 }
 0x165   : > { %1006 = vmatprep.mubr.bf16.mxu1 %v1152_v43 }
 0x16c   : > { %1007 = vmatmul.mubr.bf16.gmra.mrb[8].mxu1 %v1153_v44 }
 0x22f   : > { %v1000_v49 = vpop.f32.mrb[0].mxu1  ;;  %v996_v51 = vpop.f32.mrb[16].mxu0 }
 0x230   : > { %v678_v53 = vadd.f32 %v1000_v49, %v493_v45  ;;  %v625_v54 = vpop.f32.mrb[1].mxu1  ;;  %v674_v56 = vadd.f32 %v996_v51, %v489_v46  ;;  %v609_v57 = vpop.f32.mrb[17].mxu0 }
 0x231   : > { %v676_v59 = vadd.f32 %v625_v54, %v491_v47  ;;  %v1001_v60 = vpop.f32.mrb[2].mxu1  ;;  %v672_v61 = vadd.f32 %v609_v57, %v487_v48  ;;  %v997_v62 = vpop.f32.mrb[18].mxu0 }
 0x232   : > { %694 = vst [vmem:[#allocation2 + $0x30] sm:$0xff] %v678_v53  ;;  %v679_v63 = vadd.f32 %v1001_v60, %v494_v50  ;;  %v628_v0 = vpop.f32.mrb[3].mxu1  ;;  %690 = vst [vmem:[#allocation2 + $0x10] sm:$0xff] %v674_v56  ;;  %v675_v1 = vadd.f32 %v997_v62, %v490_v52  ;;  %v612_v2 = vpop.f32.mrb[19].mxu0 }
 0x233   : > { %692 = vst [vmem:[#allocation2 + $0x20] sm:$0xff] %v676_v59  ;;  %v677_v3 = vadd.f32 %v628_v0, %v492_v55  ;;  %688 = vst [vmem:[#allocation2] sm:$0xff] %v672_v61  ;;  %v673_v4 = vadd.f32 %v612_v2, %v488_v58 }
 0x234   : > { %695 = vst [vmem:[#allocation2 + $0x38] sm:$0xff] %v679_v63  ;;  %691 = vst [vmem:[#allocation2 + $0x18] sm:$0xff] %v675_v1 }
 0x235   : > { %693 = vst [vmem:[#allocation2 + $0x28] sm:$0xff] %v677_v3  ;;  %689 = vst [vmem:[#allocation2 + $0x8] sm:$0xff] %v673_v4 }
 0x237   : > { %v1004_v7 = vpop.f32.mrb[4].mxu1 }
 0x238   : > { %v682_v9 = vadd.f32 %v1004_v7, %v497_v5  ;;  %v641_v10 = vpop.f32.mrb[5].mxu1 }
 0x239   : > { %v680_v12 = vadd.f32 %v641_v10, %v495_v6  ;;  %v1005_v13 = vpop.f32.mrb[6].mxu1  ;;  %v710_v34 = vld [vmem:[#allocation2 + $0x10] sm:$0xff] (!%p917_p7) }
 0x23a   : > { %698 = vst [vmem:[#allocation2 + $0x50] sm:$0xff] %v682_v9  ;;  %v683_v14 = vadd.f32 %v1005_v13, %v498_v8  ;;  %v644_v15 = vpop.f32.mrb[7].mxu1  ;;  %v708_v29 = vld [vmem:[#allocation2] sm:$0xff] (!%p917_p7)  ;;  %v733_v37 = vadd.f32 (!%p917_p7), %v918_v30, %v710_v34  ;;  %v714_v41 = vld [vmem:[#allocation2 + $0x30] sm:$0xff] (!%p917_p7) }
 0x23b   : > { %696 = vst [vmem:[#allocation2 + $0x40] sm:$0xff] %v680_v12  ;;  %v681_v16 = vadd.f32 %v644_v15, %v496_v11  ;;  %v731_v32 = vadd.f32 (!%p917_p7), %v918_v30, %v708_v29  ;;  %v711_v35 = vld [vmem:[#allocation2 + $0x18] sm:$0xff] (!%p917_p7)  ;;  %v712_v36 = vld [vmem:[#allocation2 + $0x20] sm:$0xff] (!%p917_p7)  ;;  %v737_v44 = vadd.f32 (!%p917_p7), %v918_v30, %v714_v41 }
 0x23c   : > { %699 = vst [vmem:[#allocation2 + $0x58] sm:$0xff] %v683_v14  ;;  %v709_v31 = vld [vmem:[#allocation2 + $0x8] sm:$0xff] (!%p917_p7)  ;;  %v734_v38 = vadd.f32 (!%p917_p7), %v918_v30, %v711_v35  ;;  %v735_v39 = vadd.f32 (!%p917_p7), %v918_v30, %v712_v36  ;;  %v715_v42 = vld [vmem:[#allocation2 + $0x38] sm:$0xff] (!%p917_p7)  ;;  %749 = vst [vmem:[%s1502_s9 + $0x10] sm:$0xff] (!%p917_p7), %v733_v37 }
 0x23d   : > { %697 = vst [vmem:[#allocation2 + $0x48] sm:$0xff] %v681_v16  ;;  %v732_v33 = vadd.f32 (!%p917_p7), %v918_v30, %v709_v31  ;;  %v713_v40 = vld [vmem:[#allocation2 + $0x28] sm:$0xff] (!%p917_p7)  ;;  %747 = vst [vmem:[%s1502_s9] sm:$0xff] (!%p917_p7), %v731_v32  ;;  %v738_v45 = vadd.f32 (!%p917_p7), %v918_v30, %v715_v42 }
 0x23e   : > { %v736_v43 = vadd.f32 (!%p917_p7), %v918_v30, %v713_v40  ;;  %750 = vst [vmem:[%s1502_s9 + $0x18] sm:$0xff] (!%p917_p7), %v734_v38  ;;  %751 = vst [vmem:[%s1502_s9 + $0x20] sm:$0xff] (!%p917_p7), %v735_v39 }
 0x23f   : > { %v1008_v19 = vpop.f32.mrb[8].mxu1  ;;  %707 = sbr.rel (%p917_p7) target bundleno = 592 (0x250), region = 48  ;;  %748 = vst [vmem:[%s1502_s9 + $0x8] sm:$0xff] (!%p917_p7), %v732_v33  ;;  %753 = vst [vmem:[%s1502_s9 + $0x30] sm:$0xff] (!%p917_p7), %v737_v44 }
 0x240   : > { %v686_v21 = vadd.f32 %v1008_v19, %v501_v17  ;;  %v657_v22 = vpop.f32.mrb[9].mxu1  ;;  %752 = vst [vmem:[%s1502_s9 + $0x28] sm:$0xff] (!%p917_p7), %v736_v43  ;;  %754 = vst [vmem:[%s1502_s9 + $0x38] sm:$0xff] (!%p917_p7), %v738_v45 }
 0x241   : > { %v684_v24 = vadd.f32 %v657_v22, %v499_v18  ;;  %v1009_v25 = vpop.f32.mrb[10].mxu1  ;;  %v718_v48 = vld [vmem:[#allocation2 + $0x50] sm:$0xff] (!%p917_p7) }
 0x242   : > { %702 = vst [vmem:[#allocation2 + $0x70] sm:$0xff] %v686_v21  ;;  %v687_v26 = vadd.f32 %v1009_v25, %v502_v20  ;;  %v660_v27 = vpop.f32.mrb[11].mxu1  ;;  %v716_v46 = vld [vmem:[#allocation2 + $0x40] sm:$0xff] (!%p917_p7)  ;;  %v741_v51 = vadd.f32 (!%p917_p7), %v918_v30, %v718_v48 }
 0x243   : > { %700 = vst [vmem:[#allocation2 + $0x60] sm:$0xff] %v684_v24  ;;  %v685_v28 = vadd.f32 %v660_v27, %v500_v23  ;;  %v739_v49 = vadd.f32 (!%p917_p7), %v918_v30, %v716_v46  ;;  %v719_v52 = vld [vmem:[#allocation2 + $0x58] sm:$0xff] (!%p917_p7) }
 0x244   : > { %703 = vst [vmem:[#allocation2 + $0x78] sm:$0xff] %v687_v26  ;;  %v717_v47 = vld [vmem:[#allocation2 + $0x48] sm:$0xff] (!%p917_p7)  ;;  %v742_v55 = vadd.f32 (!%p917_p7), %v918_v30, %v719_v52  ;;  %757 = vst [vmem:[%s1502_s9 + $0x50] sm:$0xff] (!%p917_p7), %v741_v51 }
 0x245   : > { %701 = vst [vmem:[#allocation2 + $0x68] sm:$0xff] %v685_v28  ;;  %v740_v50 = vadd.f32 (!%p917_p7), %v918_v30, %v717_v47  ;;  %755 = vst [vmem:[%s1502_s9 + $0x40] sm:$0xff] (!%p917_p7), %v739_v49 }
 0x246   : > { %758 = vst [vmem:[%s1502_s9 + $0x58] sm:$0xff] %v742_v55 }
 0x247   : > { %756 = vst [vmem:[%s1502_s9 + $0x48] sm:$0xff] %v740_v50 }
 0x249   : > { %v722_v58 = vld [vmem:[#allocation2 + $0x70] sm:$0xff] }
 0x24a   : > { %v720_v53 = vld [vmem:[#allocation2 + $0x60] sm:$0xff]  ;;  %v745_v60 = vadd.f32 %v918_v30, %v722_v58 }
 0x24b   : > { %v743_v56 = vadd.f32 %v918_v30, %v720_v53  ;;  %v723_v59 = vld [vmem:[#allocation2 + $0x78] sm:$0xff] }
 0x24c   : > { %v721_v54 = vld [vmem:[#allocation2 + $0x68] sm:$0xff]  ;;  %v746_v61 = vadd.f32 %v918_v30, %v723_v59  ;;  %761 = vst [vmem:[%s1502_s9 + $0x70] sm:$0xff] %v745_v60 }
 0x24d   : > { %v744_v57 = vadd.f32 %v918_v30, %v721_v54  ;;  %759 = vst [vmem:[%s1502_s9 + $0x60] sm:$0xff] %v743_v56 }
 0x24e   : > { %762 = vst [vmem:[%s1502_s9 + $0x78] sm:$0xff] %v746_v61 }
 0x24f   : > { %760 = vst [vmem:[%s1502_s9 + $0x68] sm:$0xff] %v744_v57 }
 0x250 PF: > { %s925_s21 = sshll.u32 %s1294_s22, 11  ;;  %s777_s18 = sshll.u32 %s1502_s9, 4  ;;  %s1568_s18 = int_to_ptr.vmem [resolvable:$true] %s777_s18 }
 0x251   : > { %s1565_s10 = scalar_lea.hbm %s1637_s4, %s925_s21  ;;  %s1572_s7 = scalar_lea.sflag [#allocation5], %s245_s29 }
 0x252   : > { %s1184_s30 = scalar_lea.vmem %s1568_s18, 2048  ;;  %p1649_p0 = scmp.ne.s32.totalorder %s1645_s11, 0 }
 0x253   : > { %p1185_p4 = scmp.ne.s32.totalorder %s1568_s18, %s1184_s30  ;;  %s1313_s22 = smov [#allocation6]  }
 0x254   : > { %s1188_s27 = sshll.u32 %s1313_s22, 4  ;;  %s1189_s27 = int_to_ptr.vmem [resolvable:$false] %s1188_s27 }
 0x255   : > { %p1186_p1 = pnand %p1185_p4, %p1649_p0  ;;  %s1190_s26 = scalar_lea.vmem %s1189_s27, 4096 }
 0x256   : > { %p1191_p8 = scmp.lt.s32.totalorder %s1568_s18, %s1189_s27  ;;  %p1192_p3 = scmp.lt.s32.totalorder %s1190_s26, %s1184_s30 }
 0x257   : > { %p1187_p5 = pneg %p1186_p1 }
 0x258   : > { %p1193_p10 = por %p1192_p3, %p1191_p8 }
 0x25a   : > { %p1194_p11 = pnand %p1193_p10, %p1187_p5 }
 0x25c   : > { %1197 = shalt.err (!%p1194_p11)
}
 0x25d   : > { %s1198_s29 = scalar_lea.hbm %s1565_s10, 2048  ;;  %s1202_s28 = scalar_lea.hbm %s1637_s4, 4096 }
 0x25e   : > { %p1199_p6 = scmp.ne.s32.totalorder %s1565_s10, %s1198_s29  ;;  %p1203_p12 = scmp.lt.u32.totalorder %s1565_s10, %s1637_s4 }
 0x25f   : > { %p1204_p2 = scmp.lt.u32.totalorder %s1202_s28, %s1198_s29  ;;  %p1206_p4 = scmp.lt.u32.totalorder %s1198_s29, %s1565_s10 }
 0x260   : > { %p1200_p9 = pnand %p1199_p6, %p1649_p0 }
 0x261   : > { %p1205_p7 = por %p1204_p2, %p1203_p12 }
 0x262   : > { %p1201_p13 = pneg %p1200_p9 }
 0x263   : > { %p1207_p1 = por %p1206_p4, %p1205_p7 }
 0x265   : > { %p1208_p5 = pnand %p1207_p1, %p1201_p13 }
 0x267   : > { %1211 = shalt.err (!%p1208_p5)
}
 0x268   : > { %s1314_s12 = smov 128   ;;  %s1315_s8 = smov 8  }
 0x269   : > { %1028 = dma.vmem_to_hbm [thread:$0]  (%p1649_p0), %s1568_s18, 2048, %s1565_s10, %s1572_s7, %s1314_s12, %s1314_s12, %s1315_s8  }
 0x26a PF: > { %p1039_p8 = scmp.ge.s32.totalorder %s1306_s25, 2  ;;  %s792_s30 = sand.u32 1, %s1266_s15  }
 0x26b   : > { %p1650_p3 = scmp.ne.s32.totalorder %s1647_s14, 0  ;;  %s793_s22 = scalar_lea.sflag [#allocation5], %s792_s30 }
 0x26d   : > { %p1035_p10 = pnand %p1039_p8, %p1650_p3 }
 0x26f   : > { %1261 = dma.done.wait (!%p1035_p10), %s793_s22, 2048  }
 0x270   : > { %1263 = vsyncadd (!%p1035_p10), %s793_s22, 4294965248  ;;  %s20_s25 = sadd.s32 1, %s1306_s25   ;;  %s1651_s27 = sld [smem:[#allocation11_spill]] }
 0x271   : > { %p17_p11 = scmp.ge.s32.totalorder %s20_s25, 6   ;;  %s1652_s11 = sld [smem:[#allocation9_spill]] }
 0x272   : > { %s1653_s10 = sld [smem:[#allocation10_spill]]  ;;  %s1654_s15 = smov %s1270_s16 }
 0x273   : > { %s1655_s16 = smov %s1274_s17  ;;  %s1657_s18 = smov %s1282_s19 }
 0x274   : > { %s1658_s19 = smov %s1286_s20  ;;  %s1659_s20 = smov %s1431_s13 }
 0x275   : > { %s1660_s21 = smov %s1298_s23  ;;  %s1661_s22 = smov %s1302_s24 }
 0x276   : > { %s1656_s17 = smov %s1651_s27  ;;  %19 = sbr.rel (!%p17_p11) target bundleno = 9 (0x9), region = 92 }
 0x277   : > { %s1662_s23 = smov %s1652_s11 }
 0x278   : > { %s1663_s24 = smov %s1653_s10 }
 0x27d   :  { %798 = vsyncpa [#allocation4], 1 }
 0x27e   :  { %800 = vsyncpa [#allocation4 + $0x1], 1 }
 0x27f   :  { %801 = vsyncpa [#allocation5], 1 }
 0x280   :  { %803 = vsyncpa [#allocation5 + $0x1], 1 }

</bundles_post_ra>
